<compile_context>
chip_gen: v7x
topology: tpu7x:2x2x1
jax: 0.10.0
libtpu: 0.0.40
codegen_flags: <defaults>
</compile_context>

<pallas_src>
import jax
import jax.numpy as jnp
from jax.experimental import pallas as pl
from jax.experimental.pallas import tpu as pltpu
import numpy as np

EPS = 1e-5          # PyTorch BatchNorm1d default
NEG = -1e30         # bias for padded class lanes (masked out of log-softmax)

D_IN, D_H, D_OUT = 500, 100, 10      # logical sizes
P_IN, P_H, P_OUT = 512, 128, 128     # lane-dense padded sizes


# ----------------------------------------------------------------------------
# Fused Pallas kernel: BN0 -> ReLU -> FC1(+BN1) -> ReLU -> FC2(+BN2) -> ReLU
#                      -> FC3 -> LogSoftmax            (Dropout = identity)
# ----------------------------------------------------------------------------
def classifier_kernel(x_ref, s0_ref, t0_ref, w1_ref, c1_ref, w2_ref, c2_ref,
                      w3_ref, b3_ref, o_ref):
    # BatchNorm1d(500) (folded affine) + ReLU
    h0 = jnp.maximum(x_ref[...] * s0_ref[...] + t0_ref[...], 0.0)
    # Linear(500,100) with BN(100) folded into weights/bias, + ReLU
    h1 = jnp.maximum(
        jnp.dot(h0, w1_ref[...], preferred_element_type=jnp.float32)
        + c1_ref[...], 0.0)
    # Linear(100,100) with BN(100) folded, + ReLU
    h2 = jnp.maximum(
        jnp.dot(h1, w2_ref[...], preferred_element_type=jnp.float32)
        + c2_ref[...], 0.0)
    # Linear(100,10); padded class lanes carry bias = -1e30
    logits = (jnp.dot(h2, w3_ref[...], preferred_element_type=jnp.float32)
              + b3_ref[...])
    # LogSoftmax over the last dim (padded lanes contribute exp(-huge) = 0)
    m = jnp.max(logits, axis=-1, keepdims=True)
    e = jnp.exp(logits - m)
    denom = jnp.sum(e, axis=-1, keepdims=True)
    o_ref[...] = logits - m - jnp.log(denom)


# ----------------------------------------------------------------------------
# Wrapper: parameter folding, lane-dense padding, one pallas_call
# ----------------------------------------------------------------------------
def _bn_fold(gamma, beta, mean, var):
    scale = gamma / jnp.sqrt(var + EPS)
    shift = beta - mean * scale
    return scale, shift


def _pad2(a, rows, cols, value=0.0):
    r, c = a.shape
    return jnp.pad(a, ((0, rows - r), (0, cols - c)), constant_values=value)


def lenet_classifier_forward(data, p):
    """Pallas implementation of LeNetClassifier_special.forward (eval mode)."""
    B = data.shape[0]
    TM = 8 if B <= 8 else 128                  # rows per grid step (sublane >= 8)
    B_pad = ((B + TM - 1) // TM) * TM

    # Fold eval-mode BatchNorms.
    s0, t0 = _bn_fold(p["gamma0"], p["beta0"], p["mean0"], p["var0"])
    s1, t1 = _bn_fold(p["gamma1"], p["beta1"], p["mean1"], p["var1"])
    s2, t2 = _bn_fold(p["gamma2"], p["beta2"], p["mean2"], p["var2"])

    # Fold BN after Linear into the Linear:  (x@W.T + b)*s + t = x@(W.T*s) + (b*s+t)
    w1 = p["W1"].T * s1[None, :]
    c1 = p["b1"] * s1 + t1
    w2 = p["W2"].T * s2[None, :]
    c2 = p["b2"] * s2 + t2
    w3 = p["W3"].T
    b3 = p["b3"]

    # Lane-dense padding (zeros are inert: padded inputs/hidden stay 0 through
    # ReLU and contribute nothing; padded class lanes get bias -1e30).
    x_p  = _pad2(data, B_pad, P_IN)
    s0_p = _pad2(s0[None, :], 1, P_IN)
    t0_p = _pad2(t0[None, :], 1, P_IN)
    w1_p = _pad2(w1, P_IN, P_H)
    c1_p = _pad2(c1[None, :], 1, P_H)
    w2_p = _pad2(w2, P_H, P_H)
    c2_p = _pad2(c2[None, :], 1, P_H)
    w3_p = _pad2(w3, P_H, P_OUT)
    b3_p = jnp.full((1, P_OUT), NEG, jnp.float32).at[0, :D_OUT].set(b3)

    grid = (B_pad // TM,)
    row_in = pl.BlockSpec((1, P_IN), lambda i: (0, 0))
    row_h  = pl.BlockSpec((1, P_H), lambda i: (0, 0))
    row_o  = pl.BlockSpec((1, P_OUT), lambda i: (0, 0))

    out = pl.pallas_call(
        classifier_kernel,
        out_shape=jax.ShapeDtypeStruct((B_pad, P_OUT), jnp.float32),
        grid=grid,
        in_specs=[
            pl.BlockSpec((TM, P_IN), lambda i: (i, 0)),   # x tile
            row_in, row_in,                               # BN0 scale / shift
            pl.BlockSpec((P_IN, P_H), lambda i: (0, 0)),  # W1'
            row_h,                                        # c1
            pl.BlockSpec((P_H, P_H), lambda i: (0, 0)),   # W2'
            row_h,                                        # c2
            pl.BlockSpec((P_H, P_OUT), lambda i: (0, 0)), # W3
            row_o,                                        # b3 (padded -1e30)
        ],
        out_specs=pl.BlockSpec((TM, P_OUT), lambda i: (i, 0)),
        compiler_params=pltpu.CompilerParams(
            dimension_semantics=("parallel",)),
    )(x_p, s0_p, t0_p, w1_p, c1_p, w2_p, c2_p, w3_p, b3_p)

    return out[:B, :D_OUT]


# ----------------------------------------------------------------------------
# Deterministic parameter init (PyTorch shapes, synthetic values)
# ----------------------------------------------------------------------------
def init_params(key):
    ks = jax.random.split(key, 18)

    def u(k, shape, lo=-0.1, hi=0.1):
        return jax.random.uniform(k, shape, jnp.float32, lo, hi)

    return dict(
        gamma0=u(ks[0], (500,), 0.8, 1.2), beta0=u(ks[1], (500,)),
        mean0=u(ks[2], (500,)), var0=u(ks[3], (500,), 0.5, 1.5),
        W1=u(ks[4], (100, 500)), b1=u(ks[5], (100,)),
        gamma1=u(ks[6], (100,), 0.8, 1.2), beta1=u(ks[7], (100,)),
        mean1=u(ks[8], (100,)), var1=u(ks[9], (100,), 0.5, 1.5),
        W2=u(ks[10], (100, 100)), b2=u(ks[11], (100,)),
        gamma2=u(ks[12], (100,), 0.8, 1.2), beta2=u(ks[13], (100,)),
        mean2=u(ks[14], (100,)), var2=u(ks[15], (100,), 0.5, 1.5),
        W3=u(ks[16], (10, 100)), b3=u(ks[17], (10,)),
    )


# ----------------------------------------------------------------------------
# Pure-JAX reference (no padding / folding) for correctness check
# ----------------------------------------------------------------------------
def reference(data, p):
    hp = jax.lax.Precision.HIGHEST

    def bn(xx, g, b, m, v):
        return (xx - m) / jnp.sqrt(v + EPS) * g + b

    h = jax.nn.relu(bn(data, p["gamma0"], p["beta0"], p["mean0"], p["var0"]))
    h = jnp.dot(h, p["W1"].T, precision=hp) + p["b1"]
    h = jax.nn.relu(bn(h, p["gamma1"], p["beta1"], p["mean1"], p["var1"]))
    h = jnp.dot(h, p["W2"].T, precision=hp) + p["b2"]
    h = jax.nn.relu(bn(h, p["gamma2"], p["beta2"], p["mean2"], p["var2"]))
    logits = jnp.dot(h, p["W3"].T, precision=hp) + p["b3"]
    return jax.nn.log_softmax(logits, axis=-1)


if __name__ == "__main__":
    key = jax.random.PRNGKey(0)
    k_x, k_p = jax.random.split(key)

    B = 2
    data = jax.random.normal(k_x, (B, 500), jnp.float32)   # module expects 500 features
    params = init_params(k_p)

    out = jax.block_until_ready(lenet_classifier_forward(data, params))
    assert out.shape == (B, 10)

    ref = jax.block_until_ready(reference(data, params))
    np.testing.assert_allclose(np.asarray(out), np.asarray(ref),
                               rtol=2e-2, atol=2e-2)
    # log-softmax rows should (approximately) sum to 1 in prob space
    assert np.allclose(np.exp(np.asarray(out)).sum(-1), 1.0, atol=1e-3)

    print("KERNEL_OK")
</pallas_src>

<mosaic_0001>
module attributes {stable_mosaic.version = 11 : i64} {
  func.func @classifier_kernel(%arg0: i32, %arg1: memref<8x512xf32, #tpu.memory_space<vmem>>, %arg2: memref<1x512xf32, #tpu.memory_space<vmem>>, %arg3: memref<1x512xf32, #tpu.memory_space<vmem>>, %arg4: memref<512x128xf32, #tpu.memory_space<vmem>>, %arg5: memref<1x128xf32, #tpu.memory_space<vmem>>, %arg6: memref<128x128xf32, #tpu.memory_space<vmem>>, %arg7: memref<1x128xf32, #tpu.memory_space<vmem>>, %arg8: memref<128x128xf32, #tpu.memory_space<vmem>>, %arg9: memref<1x128xf32, #tpu.memory_space<vmem>>, %arg10: memref<8x128xf32, #tpu.memory_space<vmem>>) attributes {dimension_semantics = [#tpu.dimension_semantics<parallel>], iteration_bounds = array<i64: 1>, scalar_prefetch = 0 : i64, scratch_operands = 0 : i64, tpu.core_type = #tpu.core_type<tc>, window_params = [{transform_indices = @transform_0, window_bounds = array<i64: 8, 512>}, {pipeline_mode = #tpu.pipeline_mode<synchronous>, transform_indices = @transform_1, window_bounds = array<i64: 1, 512>}, {pipeline_mode = #tpu.pipeline_mode<synchronous>, transform_indices = @transform_2, window_bounds = array<i64: 1, 512>}, {pipeline_mode = #tpu.pipeline_mode<synchronous>, transform_indices = @transform_3, window_bounds = array<i64: 512, 128>}, {pipeline_mode = #tpu.pipeline_mode<synchronous>, transform_indices = @transform_4, window_bounds = array<i64: 1, 128>}, {pipeline_mode = #tpu.pipeline_mode<synchronous>, transform_indices = @transform_5, window_bounds = array<i64: 128, 128>}, {pipeline_mode = #tpu.pipeline_mode<synchronous>, transform_indices = @transform_6, window_bounds = array<i64: 1, 128>}, {pipeline_mode = #tpu.pipeline_mode<synchronous>, transform_indices = @transform_7, window_bounds = array<i64: 128, 128>}, {pipeline_mode = #tpu.pipeline_mode<synchronous>, transform_indices = @transform_8, window_bounds = array<i64: 1, 128>}, {transform_indices = @transform_9, window_bounds = array<i64: 8, 128>}]} {
    %c0 = arith.constant 0 : index
    %c0_0 = arith.constant 0 : index
    %0 = vector.load %arg1[%c0, %c0_0] : memref<8x512xf32, #tpu.memory_space<vmem>>, vector<8x512xf32>
    %c0_1 = arith.constant 0 : index
    %c0_2 = arith.constant 0 : index
    %1 = vector.load %arg2[%c0_1, %c0_2] : memref<1x512xf32, #tpu.memory_space<vmem>>, vector<1x512xf32>
    %2 = vector.broadcast %1 : vector<1x512xf32> to vector<8x512xf32>
    %3 = arith.mulf %0, %2 : vector<8x512xf32>
    %c0_3 = arith.constant 0 : index
    %c0_4 = arith.constant 0 : index
    %4 = vector.load %arg3[%c0_3, %c0_4] : memref<1x512xf32, #tpu.memory_space<vmem>>, vector<1x512xf32>
    %5 = vector.broadcast %4 : vector<1x512xf32> to vector<8x512xf32>
    %6 = arith.addf %3, %5 : vector<8x512xf32>
    %cst = arith.constant 0.000000e+00 : f32
    %7 = vector.broadcast %cst : f32 to vector<8x512xf32>
    %8 = arith.maximumf %6, %7 : vector<8x512xf32>
    %c0_5 = arith.constant 0 : index
    %c0_6 = arith.constant 0 : index
    %9 = vector.load %arg4[%c0_5, %c0_6] : memref<512x128xf32, #tpu.memory_space<vmem>>, vector<512x128xf32>
    %cst_7 = arith.constant dense<0.000000e+00> : vector<8x128xf32>
    %10 = tpu.matmul %8, %9, %cst_7 {dimension_numbers = #tpu.dot_dimension_numbers<[1], [0], [0], [1], [0, 0, 1, 1], [], []>} : vector<8x512xf32>, vector<512x128xf32>, vector<8x128xf32> -> vector<8x128xf32>
    %c0_8 = arith.constant 0 : index
    %c0_9 = arith.constant 0 : index
    %11 = vector.load %arg5[%c0_8, %c0_9] : memref<1x128xf32, #tpu.memory_space<vmem>>, vector<1x128xf32>
    %12 = vector.broadcast %11 : vector<1x128xf32> to vector<8x128xf32>
    %13 = arith.addf %10, %12 : vector<8x128xf32>
    %cst_10 = arith.constant 0.000000e+00 : f32
    %14 = vector.broadcast %cst_10 : f32 to vector<8x128xf32>
    %15 = arith.maximumf %13, %14 : vector<8x128xf32>
    %c0_11 = arith.constant 0 : index
    %c0_12 = arith.constant 0 : index
    %16 = vector.load %arg6[%c0_11, %c0_12] : memref<128x128xf32, #tpu.memory_space<vmem>>, vector<128x128xf32>
    %cst_13 = arith.constant dense<0.000000e+00> : vector<8x128xf32>
    %17 = tpu.matmul %15, %16, %cst_13 {dimension_numbers = #tpu.dot_dimension_numbers<[1], [0], [0], [1], [0, 0, 1, 1], [], []>} : vector<8x128xf32>, vector<128x128xf32>, vector<8x128xf32> -> vector<8x128xf32>
    %c0_14 = arith.constant 0 : index
    %c0_15 = arith.constant 0 : index
    %18 = vector.load %arg7[%c0_14, %c0_15] : memref<1x128xf32, #tpu.memory_space<vmem>>, vector<1x128xf32>
    %19 = vector.broadcast %18 : vector<1x128xf32> to vector<8x128xf32>
    %20 = arith.addf %17, %19 : vector<8x128xf32>
    %cst_16 = arith.constant 0.000000e+00 : f32
    %21 = vector.broadcast %cst_16 : f32 to vector<8x128xf32>
    %22 = arith.maximumf %20, %21 : vector<8x128xf32>
    %c0_17 = arith.constant 0 : index
    %c0_18 = arith.constant 0 : index
    %23 = vector.load %arg8[%c0_17, %c0_18] : memref<128x128xf32, #tpu.memory_space<vmem>>, vector<128x128xf32>
    %cst_19 = arith.constant dense<0.000000e+00> : vector<8x128xf32>
    %24 = tpu.matmul %22, %23, %cst_19 {dimension_numbers = #tpu.dot_dimension_numbers<[1], [0], [0], [1], [0, 0, 1, 1], [], []>} : vector<8x128xf32>, vector<128x128xf32>, vector<8x128xf32> -> vector<8x128xf32>
    %c0_20 = arith.constant 0 : index
    %c0_21 = arith.constant 0 : index
    %25 = vector.load %arg9[%c0_20, %c0_21] : memref<1x128xf32, #tpu.memory_space<vmem>>, vector<1x128xf32>
    %26 = vector.broadcast %25 : vector<1x128xf32> to vector<8x128xf32>
    %27 = arith.addf %24, %26 : vector<8x128xf32>
    %cst_22 = arith.constant dense<0xFF800000> : vector<8xf32>
    %28 = vector.multi_reduction <maximumf>, %27, %cst_22 [1] : vector<8x128xf32> to vector<8xf32>
    %29 = vector.shape_cast %28 : vector<8xf32> to vector<8x1xf32>
    %30 = vector.broadcast %29 : vector<8x1xf32> to vector<8x128xf32>
    %31 = arith.subf %27, %30 : vector<8x128xf32>
    %32 = math.exp %31 : vector<8x128xf32>
    %cst_23 = arith.constant dense<0.000000e+00> : vector<8xf32>
    %33 = vector.multi_reduction <add>, %32, %cst_23 [1] : vector<8x128xf32> to vector<8xf32>
    %34 = vector.shape_cast %33 : vector<8xf32> to vector<8x1xf32>
    %35 = vector.broadcast %29 : vector<8x1xf32> to vector<8x128xf32>
    %36 = arith.subf %27, %35 : vector<8x128xf32>
    %37 = math.log %34 : vector<8x1xf32>
    %38 = vector.broadcast %37 : vector<8x1xf32> to vector<8x128xf32>
    %39 = arith.subf %36, %38 : vector<8x128xf32>
    %c0_24 = arith.constant 0 : index
    %c0_25 = arith.constant 0 : index
    %40 = vector.load %arg10[%c0_24, %c0_25] : memref<8x128xf32, #tpu.memory_space<vmem>>, vector<8x128xf32>
    tpu.vector_store %arg10[%c0_24, %c0_25], %39 {strides = array<i32>} : memref<8x128xf32, #tpu.memory_space<vmem>>, vector<8x128xf32>,
    return
  }
  func.func @transform_0(%arg0: i32) -> (i32, i32) {
    %c0_i32 = arith.constant 0 : i32
    %c0_i32_0 = arith.constant 0 : i32
    return %arg0, %c0_i32 : i32, i32
  }
  func.func @transform_1(%arg0: i32) -> (i32, i32) {
    %c0_i32 = arith.constant 0 : i32
    %c0_i32_0 = arith.constant 0 : i32
    %c0_i32_1 = arith.constant 0 : i32
    return %c0_i32, %c0_i32_0 : i32, i32
  }
  func.func @transform_2(%arg0: i32) -> (i32, i32) {
    %c0_i32 = arith.constant 0 : i32
    %c0_i32_0 = arith.constant 0 : i32
    %c0_i32_1 = arith.constant 0 : i32
    return %c0_i32, %c0_i32_0 : i32, i32
  }
  func.func @transform_3(%arg0: i32) -> (i32, i32) {
    %c0_i32 = arith.constant 0 : i32
    %c0_i32_0 = arith.constant 0 : i32
    %c0_i32_1 = arith.constant 0 : i32
    return %c0_i32, %c0_i32_0 : i32, i32
  }
  func.func @transform_4(%arg0: i32) -> (i32, i32) {
    %c0_i32 = arith.constant 0 : i32
    %c0_i32_0 = arith.constant 0 : i32
    %c0_i32_1 = arith.constant 0 : i32
    return %c0_i32, %c0_i32_0 : i32, i32
  }
  func.func @transform_5(%arg0: i32) -> (i32, i32) {
    %c0_i32 = arith.constant 0 : i32
    %c0_i32_0 = arith.constant 0 : i32
    %c0_i32_1 = arith.constant 0 : i32
    return %c0_i32, %c0_i32_0 : i32, i32
  }
  func.func @transform_6(%arg0: i32) -> (i32, i32) {
    %c0_i32 = arith.constant 0 : i32
    %c0_i32_0 = arith.constant 0 : i32
    %c0_i32_1 = arith.constant 0 : i32
    return %c0_i32, %c0_i32_0 : i32, i32
  }
  func.func @transform_7(%arg0: i32) -> (i32, i32) {
    %c0_i32 = arith.constant 0 : i32
    %c0_i32_0 = arith.constant 0 : i32
    %c0_i32_1 = arith.constant 0 : i32
    return %c0_i32, %c0_i32_0 : i32, i32
  }
  func.func @transform_8(%arg0: i32) -> (i32, i32) {
    %c0_i32 = arith.constant 0 : i32
    %c0_i32_0 = arith.constant 0 : i32
    %c0_i32_1 = arith.constant 0 : i32
    return %c0_i32, %c0_i32_0 : i32, i32
  }
  func.func @transform_9(%arg0: i32) -> (i32, i32) {
    %c0_i32 = arith.constant 0 : i32
    %c0_i32_0 = arith.constant 0 : i32
    return %arg0, %c0_i32 : i32, i32
  }
}

</mosaic_0001>

<bundles_post_ra>
// kernel: tpu_custom_call.1
= control target key start
LH: loop header
LB: loop body
LE: loop exit
PB: predicated region body
PF: predicated region fallthrough
CT: control target
= control target key end

     0   :  { %14 = vsyncpa [#allocation3], 0  ;;  %s1198_s0 = inlined_call_operand.hbm [shape: f32[8,512], index: 0, kind: input, shape index: {}]   ;;  %s1199_s1 = inlined_call_operand.hbm [shape: f32[1,512], index: 1, kind: input, shape index: {}]   ;;  %s1200_s2 = inlined_call_operand.vmem [shape: f32[1,512], index: 2, kind: input, shape index: {}]   ;;  %s1201_s3 = inlined_call_operand.hbm [shape: f32[512,128], index: 3, kind: input, shape index: {}]   ;;  %s1202_s4 = inlined_call_operand.vmem [shape: f32[1,128], index: 4, kind: input, shape index: {}]   ;;  %s1203_s5 = inlined_call_operand.hbm [shape: f32[128,128], index: 5, kind: input, shape index: {}]   ;;  %s1204_s6 = inlined_call_operand.vmem [shape: f32[1,128], index: 6, kind: input, shape index: {}]   ;;  %s1205_s7 = inlined_call_operand.hbm [shape: f32[128,128], index: 7, kind: input, shape index: {}]   ;;  %s1206_s8 = inlined_call_operand.vmem [shape: f32[1,128], index: 8, kind: input, shape index: {}]   ;;  %s1207_s9 = inlined_call_operand.hbm [shape: f32[8,128], index: 9, kind: output, shape index: {}]  }
   0x1   :  { %15 = vsyncpa [#allocation6], 0 }
   0x2   :  { %16 = vsyncpa [#allocation9], 0 }
   0x3   :  { %17 = vsyncpa [#allocation4], 0  ;;  %s1028_s30 = smov [#allocation5]   ;;  %s888_s13 = scalar_lea.hbm %s1199_s1, 64 }
   0x4   :  { %s34_s10 = sshll.u32 %s1028_s30, 4  ;;  %p889_p0 = scmp.ne.s32.totalorder %s1199_s1, %s888_s13  ;;  %s35_s10 = int_to_ptr.vmem [resolvable:$true] %s34_s10 }
   0x5   :  { %p892_p1 = scmp.lt.u32.totalorder %s888_s13, %s1199_s1 }
   0x7   :  { %p894_p2 = pnand %p892_p1, %p889_p0 }
   0x9   :  { %897 = shalt.err (!%p894_p2)
}
   0xa   :  { %s898_s18 = scalar_lea.vmem %s35_s10, 64  ;;  %p903_p4 = scmp.lt.s32.totalorder %s35_s10, %s35_s10 }
   0xb   :  { %p899_p3 = scmp.ne.s32.totalorder %s35_s10, %s898_s18  ;;  %p904_p5 = scmp.lt.s32.totalorder %s898_s18, %s898_s18 }
   0xd   :  { %p905_p6 = por %p904_p5, %p903_p4 }
   0xf   :  { %p906_p7 = pnand %p905_p6, %p899_p3 }
  0x11   :  { %909 = shalt.err (!%p906_p7)
}
  0x12   :  { %37 = dma.hbm_to_vmem [thread:$0]  %s1199_s1, 64, %s35_s10, [#allocation6]  }
  0x13   :  { %s1029_s21 = smov [#allocation8]   ;;  %s1030_s23 = smov [#allocation2]  }
  0x14   :  { %s59_s22 = sshll.u32 %s1029_s21, 4  ;;  %s24_s24 = sshll.u32 %s1030_s23, 4  ;;  %s60_s22 = int_to_ptr.vmem [resolvable:$true] %s59_s22  ;;  %s25_s24 = int_to_ptr.vmem [resolvable:$true] %s24_s24 }
  0x15   :  { %s910_s27 = scalar_lea.hbm %s1203_s5, 2048 }
  0x16   :  { %p911_p8 = scmp.ne.s32.totalorder %s1203_s5, %s910_s27  ;;  %p914_p9 = scmp.lt.u32.totalorder %s910_s27, %s1203_s5 }
  0x18   :  { %p916_p10 = pnand %p914_p9, %p911_p8 }
  0x1a   :  { %919 = shalt.err (!%p916_p10)
}
  0x1b   :  { %s920_s1 = scalar_lea.vmem %s60_s22, 2048  ;;  %p925_p12 = scmp.lt.s32.totalorder %s60_s22, %s60_s22 }
  0x1c   :  { %p921_p11 = scmp.ne.s32.totalorder %s60_s22, %s920_s1  ;;  %p926_p13 = scmp.lt.s32.totalorder %s920_s1, %s920_s1 }
  0x1e   :  { %p927_p0 = por %p926_p13, %p925_p12 }
  0x20   :  { %p928_p1 = pnand %p927_p0, %p921_p11 }
  0x22   :  { %931 = shalt.err (!%p928_p1)
}
  0x23   :  { %s1031_s10 = smov 128   ;;  %s1032_s12 = smov 8  }
  0x24   :  { %65 = dma.hbm_to_vmem [thread:$0]  %s1203_s5, 2048, %s60_s22, [#allocation9], %s1031_s10, %s1031_s10, %s1032_s12  }
  0x25   :  { %s932_s17 = scalar_lea.hbm %s1198_s0, 512 }
  0x26   :  { %p933_p2 = scmp.ne.s32.totalorder %s1198_s0, %s932_s17  ;;  %p936_p3 = scmp.lt.u32.totalorder %s932_s17, %s1198_s0 }
  0x28   :  { %p938_p4 = pnand %p936_p3, %p933_p2 }
  0x2a   :  { %941 = shalt.err (!%p938_p4)
}
  0x2b   :  { %s942_s23 = scalar_lea.vmem %s25_s24, 512  ;;  %p947_p6 = scmp.lt.s32.totalorder %s25_s24, %s25_s24 }
  0x2c   :  { %p943_p5 = scmp.ne.s32.totalorder %s25_s24, %s942_s23  ;;  %p948_p7 = scmp.lt.s32.totalorder %s942_s23, %s942_s23 }
  0x2e   :  { %p949_p8 = por %p948_p7, %p947_p6 }
  0x30   :  { %p950_p9 = pnand %p949_p8, %p943_p5 }
  0x32   :  { %953 = shalt.err (!%p950_p9)
}
  0x33   :  { %27 = dma.hbm_to_vmem [thread:$0]  %s1198_s0, 512, %s25_s24, [#allocation3]  }
  0x34   :  { %s1033_s25 = smov [#allocation7]   ;;  %s1034_s27 = smov [#allocation10]  }
  0x35   :  { %s45_s26 = sshll.u32 %s1033_s25, 4  ;;  %s73_s28 = sshll.u32 %s1034_s27, 4  ;;  %s46_s26 = int_to_ptr.vmem [resolvable:$true] %s45_s26  ;;  %s74_s28 = int_to_ptr.vmem [resolvable:$true] %s73_s28 }
  0x36   :  { %s954_s11 = scalar_lea.hbm %s1201_s3, 8192 }
  0x37   :  { %p955_p10 = scmp.ne.s32.totalorder %s1201_s3, %s954_s11  ;;  %p958_p11 = scmp.lt.u32.totalorder %s954_s11, %s1201_s3 }
  0x39   :  { %p960_p12 = pnand %p958_p11, %p955_p10 }
  0x3b   :  { %963 = shalt.err (!%p960_p12)
}
  0x3c   :  { %s964_s0 = scalar_lea.vmem %s46_s26, 8192  ;;  %p969_p0 = scmp.lt.s32.totalorder %s46_s26, %s46_s26 }
  0x3d   :  { %p965_p13 = scmp.ne.s32.totalorder %s46_s26, %s964_s0  ;;  %p970_p1 = scmp.lt.s32.totalorder %s964_s0, %s964_s0 }
  0x3f   :  { %p971_p2 = por %p970_p1, %p969_p0 }
  0x41   :  { %p972_p3 = pnand %p971_p2, %p965_p13 }
  0x43   :  { %975 = shalt.err (!%p972_p3)
}
  0x44   :  { %51 = dma.hbm_to_vmem [thread:$0]  %s1201_s3, 8192, %s46_s26, [#allocation6], %s1031_s10, %s1031_s10, %s1032_s12  }
  0x45   :  { %s976_s19 = scalar_lea.hbm %s1205_s7, 2048 }
  0x46   :  { %p977_p4 = scmp.ne.s32.totalorder %s1205_s7, %s976_s19  ;;  %p980_p5 = scmp.lt.u32.totalorder %s976_s19, %s1205_s7 }
  0x48   :  { %p982_p6 = pnand %p980_p5, %p977_p4 }
  0x4a   :  { %985 = shalt.err (!%p982_p6)
}
  0x4b   :  { %s986_s22 = scalar_lea.vmem %s74_s28, 2048  ;;  %p991_p8 = scmp.lt.s32.totalorder %s74_s28, %s74_s28 }
  0x4c   :  { %p987_p7 = scmp.ne.s32.totalorder %s74_s28, %s986_s22  ;;  %p992_p9 = scmp.lt.s32.totalorder %s986_s22, %s986_s22 }
  0x4e   :  { %p993_p10 = por %p992_p9, %p991_p8 }
  0x50   :  { %p994_p11 = pnand %p993_p10, %p987_p7 }
  0x52   :  { %997 = shalt.err (!%p994_p11)
}
  0x53   :  { %79 = dma.hbm_to_vmem [thread:$0]  %s1205_s7, 2048, %s74_s28, [#allocation9], %s1031_s10, %s1031_s10, %s1032_s12  }
  0x54   :  { %1020 = dma.done.wait [#allocation3], 512  }
  0x55   :  { %1021 = vsyncadd [#allocation3], 4294966784 }
  0x56   :  { %1022 = dma.done.wait [#allocation6], 8256  }
  0x57   :  { %1023 = vsyncadd [#allocation6], 4294959040 }
  0x58   :  { %1024 = dma.done.wait [#allocation9], 4096  }
  0x59   :  { %1025 = vsyncadd [#allocation9], 4294963200  ;;  %v173_v0 = vld [vmem:[#allocation7 + $0x80] sm:$0xff]  ;;  %v174_v1 = vld [vmem:[#allocation7 + $0x88] sm:$0xff]  ;;  %v103_v47 = vlaneseq  ;;  %vm1036_vm0 = vmmov 0  }
  0x5a   :  { %v157_v2 = vld [vmem:[#allocation7] sm:$0xff]  ;;  %v761_v3 = vpack.c.bf16 %v174_v1, %v173_v0  ;;  %v158_v4 = vld [vmem:[#allocation7 + $0x8] sm:$0xff]  ;;  %v175_v11 = vld [vmem:[#allocation7 + $0x90] sm:$0xff] }
  0x5b   :  { %v205_v5 = vld [vmem:[#allocation7 + $0x180] sm:$0xff]  ;;  %v206_v6 = vld [vmem:[#allocation7 + $0x188] sm:$0xff]  ;;  %v763_v7 = vpack.c.bf16 %v158_v4, %v157_v2  ;;  %v176_v13 = vld [vmem:[#allocation7 + $0x98] sm:$0xff]  ;;  %v104_v61 = vshrl.u32 %v103_v47, 7 }
  0x5c   :  { %v793_v8 = vpack.c.bf16 %v206_v6, %v205_v5  ;;  %v189_v9 = vld [vmem:[#allocation7 + $0x100] sm:$0xff]  ;;  %v190_v10 = vld [vmem:[#allocation7 + $0x108] sm:$0xff]  ;;  %762 = vmatprep.subr.bf16.mxu0 %v761_v3  ;;  %v159_v14 = vld [vmem:[#allocation7 + $0x10] sm:$0xff]  ;;  %v765_v16 = vpack.c.bf16 %v176_v13, %v175_v11 }
  0x5d   :  { %v795_v12 = vpack.c.bf16 %v190_v10, %v189_v9  ;;  %v160_v15 = vld [vmem:[#allocation7 + $0x18] sm:$0xff]  ;;  %764 = vmatpush3.bf16.msra.mxu0 %v763_v7  ;;  %v207_v18 = vld [vmem:[#allocation7 + $0x190] sm:$0xff]  ;;  %v177_v23 = vld [vmem:[#allocation7 + $0xa0] sm:$0xff]  ;;  %v105_v13 = vsub.s32 0, %v104_v61 }
  0x5e   :  { %794 = vmatprep.subr.bf16.mxu1 %v793_v8  ;;  %v767_v17 = vpack.c.bf16 %v160_v15, %v159_v14  ;;  %v208_v19 = vld [vmem:[#allocation7 + $0x198] sm:$0xff]  ;;  %v191_v20 = vld [vmem:[#allocation7 + $0x110] sm:$0xff]  ;;  %v178_v24 = vld [vmem:[#allocation7 + $0xa8] sm:$0xff]  ;;  %766 = vmatprep.subr.bf16.mxu0 %v765_v16  ;;  %v117_v14 = vsub.s32 3, %v104_v61 }
  0x5f   :  { %796 = vmatpush3.bf16.msra.mxu1 %v795_v12  ;;  %v797_v21 = vpack.c.bf16 %v208_v19, %v207_v18  ;;  %v192_v22 = vld [vmem:[#allocation7 + $0x118] sm:$0xff]  ;;  %v769_v26 = vpack.c.bf16 %v178_v24, %v177_v23  ;;  %v161_v27 = vld [vmem:[#allocation7 + $0x20] sm:$0xff]  ;;  %v162_v28 = vld [vmem:[#allocation7 + $0x28] sm:$0xff]  ;;  %v109_v12 = vsub.s32 1, %v104_v61 }
  0x60   :  { %v799_v25 = vpack.c.bf16 %v192_v22, %v191_v20  ;;  %v209_v29 = vld [vmem:[#allocation7 + $0x1a0] sm:$0xff]  ;;  %v210_v30 = vld [vmem:[#allocation7 + $0x1a8] sm:$0xff]  ;;  %v771_v33 = vpack.c.bf16 %v162_v28, %v161_v27  ;;  %v179_v35 = vld [vmem:[#allocation7 + $0xb0] sm:$0xff] }
  0x61   :  { %798 = vmatprep.subr.bf16.mxu1 %v797_v21  ;;  %v193_v31 = vld [vmem:[#allocation7 + $0x120] sm:$0xff]  ;;  %v194_v32 = vld [vmem:[#allocation7 + $0x128] sm:$0xff]  ;;  %768 = vmatpush3.bf16.msra.mxu0 %v767_v17  ;;  %v801_v34 = vpack.c.bf16 %v210_v30, %v209_v29  ;;  %v180_v36 = vld [vmem:[#allocation7 + $0xb8] sm:$0xff]  ;;  %v113_v17 = vsub.s32 2, %v104_v61 }
  0x62   :  { %v163_v37 = vld [vmem:[#allocation7 + $0x30] sm:$0xff]  ;;  %770 = vmatprep.subr.bf16.mxu0 %v769_v26  ;;  %v803_v38 = vpack.c.bf16 %v194_v32, %v193_v31  ;;  %v773_v39 = vpack.c.bf16 %v180_v36, %v179_v35  ;;  %v164_v40 = vld [vmem:[#allocation7 + $0x38] sm:$0xff]  ;;  %v181_v46 = vld [vmem:[#allocation7 + $0xc0] sm:$0xff] }
  0x63   :  { %800 = vmatpush3.bf16.msra.mxu1 %v799_v25  ;;  %v211_v41 = vld [vmem:[#allocation7 + $0x1b0] sm:$0xff]  ;;  %v212_v42 = vld [vmem:[#allocation7 + $0x1b8] sm:$0xff]  ;;  %v182_v48 = vld [vmem:[#allocation7 + $0xc8] sm:$0xff]  ;;  %v775_v49 = vpack.c.bf16 %v164_v40, %v163_v37 }
  0x64   :  { %802 = vmatprep.subr.bf16.mxu1 %v801_v34  ;;  %v805_v43 = vpack.c.bf16 %v212_v42, %v211_v41  ;;  %v195_v44 = vld [vmem:[#allocation7 + $0x130] sm:$0xff]  ;;  %v196_v45 = vld [vmem:[#allocation7 + $0x138] sm:$0xff]  ;;  %v213_v50 = vld [vmem:[#allocation7 + $0x1c0] sm:$0xff]  ;;  %v777_v53 = vpack.c.bf16 %v182_v48, %v181_v46 }
  0x65   :  { %772 = vmatpush3.bf16.msra.mxu0 %v771_v33  ;;  %v214_v51 = vld [vmem:[#allocation7 + $0x1c8] sm:$0xff]  ;;  %v807_v52 = vpack.c.bf16 %v196_v45, %v195_v44  ;;  %v165_v54 = vld [vmem:[#allocation7 + $0x40] sm:$0xff]  ;;  %v183_v59 = vld [vmem:[#allocation7 + $0xd0] sm:$0xff] }
  0x66   :  { %774 = vmatprep.subr.bf16.mxu0 %v773_v39  ;;  %v166_v55 = vld [vmem:[#allocation7 + $0x48] sm:$0xff]  ;;  %v197_v56 = vld [vmem:[#allocation7 + $0x140] sm:$0xff]  ;;  %v809_v57 = vpack.c.bf16 %v214_v51, %v213_v50  ;;  %v184_v60 = vld [vmem:[#allocation7 + $0xd8] sm:$0xff] }
  0x67   :  { %804 = vmatpush3.bf16.msra.mxu1 %v803_v38  ;;  %v198_v58 = vld [vmem:[#allocation7 + $0x148] sm:$0xff]  ;;  %v215_v62 = vld [vmem:[#allocation7 + $0x1d0] sm:$0xff]  ;;  %v216_v63 = vld [vmem:[#allocation7 + $0x1d8] sm:$0xff]  ;;  %v779_v0 = vpack.c.bf16 %v166_v55, %v165_v54  ;;  %v781_v4 = vpack.c.bf16 %v184_v60, %v183_v59 }
  0x68   :  { %806 = vmatprep.subr.bf16.mxu1 %v805_v43  ;;  %v167_v1 = vld [vmem:[#allocation7 + $0x50] sm:$0xff]  ;;  %v168_v2 = vld [vmem:[#allocation7 + $0x58] sm:$0xff]  ;;  %v811_v3 = vpack.c.bf16 %v198_v58, %v197_v56  ;;  %v185_v7 = vld [vmem:[#allocation7 + $0xe0] sm:$0xff]  ;;  %v813_v8 = vpack.c.bf16 %v216_v63, %v215_v62 }
  0x69   :  { %776 = vmatpush3.bf16.msra.mxu0 %v775_v49  ;;  %v199_v5 = vld [vmem:[#allocation7 + $0x150] sm:$0xff]  ;;  %v200_v6 = vld [vmem:[#allocation7 + $0x158] sm:$0xff]  ;;  %v186_v9 = vld [vmem:[#allocation7 + $0xe8] sm:$0xff]  ;;  %v783_v18 = vpack.c.bf16 %v168_v2, %v167_v1 }
  0x6a   :  { %778 = vmatprep.subr.bf16.mxu0 %v777_v53  ;;  %v169_v10 = vld [vmem:[#allocation7 + $0x60] sm:$0xff]  ;;  %v170_v11 = vld [vmem:[#allocation7 + $0x68] sm:$0xff]  ;;  %v187_v21 = vld [vmem:[#allocation7 + $0xf0] sm:$0xff]  ;;  %v815_v22 = vpack.c.bf16 %v200_v6, %v199_v5  ;;  %v785_v23 = vpack.c.bf16 %v186_v9, %v185_v7 }
  0x6b   :  { %808 = vmatpush3.bf16.msra.mxu1 %v807_v52  ;;  %v217_v15 = vld [vmem:[#allocation7 + $0x1e0] sm:$0xff]  ;;  %v218_v16 = vld [vmem:[#allocation7 + $0x1e8] sm:$0xff]  ;;  %v787_v24 = vpack.c.bf16 %v170_v11, %v169_v10  ;;  %v188_v25 = vld [vmem:[#allocation7 + $0xf8] sm:$0xff] }
  0x6c   :  { %810 = vmatprep.subr.bf16.mxu1 %v809_v57  ;;  %v201_v19 = vld [vmem:[#allocation7 + $0x160] sm:$0xff]  ;;  %v202_v20 = vld [vmem:[#allocation7 + $0x168] sm:$0xff]  ;;  %v101_v27 = vld [vmem:[#allocation5] sm:$0xf]  ;;  %v817_v28 = vpack.c.bf16 %v218_v16, %v217_v15  ;;  %v789_v47 = vpack.c.bf16 %v188_v25, %v187_v21  ;;  %v1037_v25 = vmov 0.0  }
  0x6d   :  { %780 = vmatpush3.bf16.msra.mxu0 %v779_v0  ;;  %v98_v26 = vld [vmem:[#allocation2 + $0x8] sm:$0xff]  ;;  %v110_v29 = vrot.slane %v101_v27, %v109_v12  ;;  %v127_v30 = vld [vmem:[%s1200_s2] sm:$0xf]  ;;  %v106_v32 = vrot.slane %v101_v27, %v105_v13  ;;  %v100_v33 = vld [vmem:[#allocation2 + $0x18] sm:$0xff]  ;;  %v118_v34 = vrot.slane %v101_v27, %v117_v14  ;;  %v114_v41 = vrot.slane %v101_v27, %v113_v17 }
  0x6e   :  { %782 = vmatprep.subr.bf16.mxu0 %v781_v4  ;;  %v97_v31 = vld [vmem:[#allocation2] sm:$0xff]  ;;  %v219_v35 = vld [vmem:[#allocation7 + $0x1f0] sm:$0xff]  ;;  %v136_v37 = vrot.slane %v127_v30, %v109_v12  ;;  %v132_v38 = vrot.slane %v127_v30, %v105_v13  ;;  %v144_v39 = vrot.slane %v127_v30, %v117_v14  ;;  %v140_v45 = vrot.slane %v127_v30, %v113_v17  ;;  %v370_v63 = vld [vmem:[#allocation8 + $0x8] sm:$0xff] }
  0x6f   :  { %812 = vmatpush3.bf16.msra.mxu1 %v811_v3  ;;  %v220_v36 = vld [vmem:[#allocation7 + $0x1f8] sm:$0xff]  ;;  %v99_v40 = vld [vmem:[#allocation2 + $0x10] sm:$0xff]  ;;  %v124_v42 = vmul.f32 %v110_v29, %v98_v26  ;;  %v123_v43 = vmul.f32 %v106_v32, %v97_v31  ;;  %v126_v44 = vmul.f32 %v118_v34, %v100_v33  ;;  %v819_v46 = vpack.c.bf16 %v202_v20, %v201_v19  ;;  %v369_v62 = vld [vmem:[#allocation8] sm:$0xff] }
  0x70   :  { %814 = vmatprep.subr.bf16.mxu1 %v813_v8  ;;  %v171_v48 = vld [vmem:[#allocation7 + $0x70] sm:$0xff]  ;;  %v172_v49 = vld [vmem:[#allocation7 + $0x78] sm:$0xff]  ;;  %v125_v50 = vmul.f32 %v114_v41, %v99_v40  ;;  %v821_v51 = vpack.c.bf16 %v220_v36, %v219_v35  ;;  %v826_v2 = vpack.c.bf16 %v370_v63, %v369_v62  ;;  %v1035_v3 = vmov 0.0|0.0   ;;  %v373_v7 = vld [vmem:[#allocation8 + $0x20] sm:$0xff] }
  0x71   :  { %784 = vmatpush3.bf16.msra.mxu0 %v783_v18  ;;  %v203_v52 = vld [vmem:[#allocation7 + $0x170] sm:$0xff]  ;;  %v204_v53 = vld [vmem:[#allocation7 + $0x178] sm:$0xff]  ;;  %v150_v54 = vadd.f32 %v136_v37, %v124_v42  ;;  %v152_v55 = vadd.f32 %v144_v39, %v126_v44  ;;  %v149_v56 = vadd.f32 %v132_v38, %v123_v43  ;;  %v791_v57 = vpack.c.bf16 %v172_v49, %v171_v48  ;;  %v374_v8 = vld [vmem:[#allocation8 + $0x28] sm:$0xff] }
  0x72   :  { %786 = vmatprep.subr.bf16.mxu0 %v785_v23  ;;  %v151_v60 = vadd.f32 %v140_v45, %v125_v50  ;;  %v823_v61 = vpack.c.bf16 %v204_v53, %v203_v52  ;;  %v371_v4 = vld [vmem:[#allocation8 + $0x10] sm:$0xff]  ;;  %v372_v5 = vld [vmem:[#allocation8 + $0x18] sm:$0xff]  ;;  %v832_v9 = vpack.c.bf16 %v374_v8, %v373_v7  ;;  %v377_v13 = vld [vmem:[#allocation8 + $0x40] sm:$0xff] }
  0x73   :  { %816 = vmatpush3.bf16.msra.mxu1 %v815_v22  ;;  %v154_v58 = vmax.f32 %v150_v54, 0.0  ;;  %v156_v59 = vmax.f32 %v152_v55, 0.0  ;;  %v153_v0 = vmax.f32 %v149_v56, 0.0  ;;  %v829_v6 = vpack.c.bf16 %v372_v5, %v371_v4  ;;  %v375_v10 = vld [vmem:[#allocation8 + $0x30] sm:$0xff]  ;;  %v376_v11 = vld [vmem:[#allocation8 + $0x38] sm:$0xff]  ;;  %v378_v14 = vld [vmem:[#allocation8 + $0x48] sm:$0xff] }
  0x74   :  { %818 = vmatprep.subr.bf16.mxu1 %v817_v28  ;;  %v155_v1 = vmax.f32 %v151_v60, 0.0  ;;  %v835_v12 = vpack.c.bf16 %v376_v11, %v375_v10  ;;  %v838_v15 = vpack.c.bf16 %v378_v14, %v377_v13  ;;  %v379_v16 = vld [vmem:[#allocation8 + $0x50] sm:$0xff]  ;;  %v380_v17 = vld [vmem:[#allocation8 + $0x58] sm:$0xff]  ;;  %v381_v19 = vld [vmem:[#allocation8 + $0x60] sm:$0xff] }
  0x75   :  { %788 = vmatpush3.bf16.msra.mxu0 %v787_v24  ;;  %292 = vmatprep.mubr.f32.mxu0 %v154_v58  ;;  %v841_v18 = vpack.c.bf16 %v380_v17, %v379_v16  ;;  %v382_v20 = vld [vmem:[#allocation8 + $0x68] sm:$0xff]  ;;  %v383_v22 = vld [vmem:[#allocation8 + $0x70] sm:$0xff]  ;;  %v384_v23 = vld [vmem:[#allocation8 + $0x78] sm:$0xff] }
  0x76   :  { %790 = vmatprep.subr.bf16.mxu0 %v789_v47  ;;  %362 = vmatprep.mubr.f32.mxu1 %v156_v59  ;;  %v844_v21 = vpack.c.bf16 %v382_v20, %v381_v19  ;;  %v847_v24 = vpack.c.bf16 %v384_v23, %v383_v22  ;;  %v463_v26 = vld [vmem:[#allocation10] sm:$0xff]  ;;  %v464_v27 = vld [vmem:[#allocation10 + $0x8] sm:$0xff]  ;;  %v465_v28 = vld [vmem:[#allocation10 + $0x10] sm:$0xff] }
  0x77   :  { %820 = vmatpush3.bf16.msra.mxu1 %v819_v46  ;;  %v850_v29 = vpack.c.bf16 %v464_v27, %v463_v26  ;;  %v466_v30 = vld [vmem:[#allocation10 + $0x18] sm:$0xff]  ;;  %v467_v32 = vld [vmem:[#allocation10 + $0x20] sm:$0xff]  ;;  %v468_v33 = vld [vmem:[#allocation10 + $0x28] sm:$0xff] }
  0x78   :  { %822 = vmatprep.subr.bf16.mxu1 %v821_v51  ;;  %v853_v31 = vpack.c.bf16 %v466_v30, %v465_v28  ;;  %v856_v34 = vpack.c.bf16 %v468_v33, %v467_v32  ;;  %v469_v35 = vld [vmem:[#allocation10 + $0x30] sm:$0xff]  ;;  %v470_v36 = vld [vmem:[#allocation10 + $0x38] sm:$0xff]  ;;  %v471_v38 = vld [vmem:[#allocation10 + $0x40] sm:$0xff] }
  0x79   :  { %792 = vmatpush3.bf16.msra.mxu0 %v791_v57  ;;  %v859_v37 = vpack.c.bf16 %v470_v36, %v469_v35  ;;  %v472_v39 = vld [vmem:[#allocation10 + $0x48] sm:$0xff]  ;;  %v473_v41 = vld [vmem:[#allocation10 + $0x50] sm:$0xff]  ;;  %v474_v42 = vld [vmem:[#allocation10 + $0x58] sm:$0xff] }
  0x7a   :  { %825 = vmatprep.subr.bf16.mxu0 %v1035_v3  ;;  %v862_v40 = vpack.c.bf16 %v472_v39, %v471_v38  ;;  %v865_v43 = vpack.c.bf16 %v474_v42, %v473_v41  ;;  %v475_v44 = vld [vmem:[#allocation10 + $0x60] sm:$0xff]  ;;  %v476_v45 = vld [vmem:[#allocation10 + $0x68] sm:$0xff]  ;;  %v584_v48 = vld [vmem:[%s1202_s4] ss:$0 sm:$0xff] }
  0x7b   :  { %824 = vmatpush3.bf16.msra.mxu1 %v823_v61  ;;  %v868_v46 = vpack.c.bf16 %v476_v45, %v475_v44  ;;  %v477_v57 = vld [vmem:[#allocation10 + $0x70] sm:$0xff]  ;;  %v478_v58 = vld [vmem:[#allocation10 + $0x78] sm:$0xff] }
  0x7c   :  { %849 = vmatprep.subr.bf16.mxu1 %v1035_v3  ;;  %293 = vmatmul.mubr.f32.vlgmr.msra.gmra.mrb[0].mxu0 %v153_v0  ;;  %v871_v59 = vpack.c.bf16 %v478_v58, %v477_v57  ;;  %v585_v60 = vld [vmem:[%s1204_s6] ss:$0 sm:$0xff]  ;;  %s1038_s6 = smov [#allocation11]  }
  0x7d   :  { %827 = vmatpush3.bf16.msra.mxu0 %v826_v2  ;;  %723 = vmatprep.mubr.msk.f32.mxu0 %vm1036_vm0, %v1037_v25  ;;  %s573_s29 = sshll.u32 %s1038_s6, 4  ;;  %s574_s29 = int_to_ptr.vmem [resolvable:$true] %s573_s29 }
  0x7e   :  { %363 = vmatmul.mubr.f32.vlgmr.msra.gmra.mrb[0].mxu1 %v155_v1  ;;  %828 = vmatprep.subr.bf16.mxu0 %v1035_v3  ;;  %v586_v1 = vld [vmem:[%s1206_s8] ss:$0 sm:$0xff]  ;;  %s998_s8 = scalar_lea.vmem %s574_s29, 128  ;;  %p1003_p13 = scmp.lt.s32.totalorder %s574_s29, %s574_s29 }
  0x7f   :  { %758 = vmatprep.mubr.msk.f32.mxu1 %vm1036_vm0, %v1037_v25  ;;  %851 = vmatpush3.bf16.msra.mxu1 %v850_v29  ;;  %p999_p12 = scmp.ne.s32.totalorder %s574_s29, %s998_s8  ;;  %p1004_p0 = scmp.lt.s32.totalorder %s998_s8, %s998_s8 }
  0x80   :  { %852 = vmatprep.subr.bf16.mxu1 %v1035_v3 }
  0x81   :  { %830 = vmatpush3.bf16.msra.mxu0 %v829_v6  ;;  %p1005_p1 = por %p1004_p0, %p1003_p13 }
  0x82   :  { %831 = vmatprep.subr.bf16.mxu0 %v1035_v3 }
  0x83   :  { %854 = vmatpush3.bf16.msra.mxu1 %v853_v31  ;;  %p1006_p2 = pnand %p1005_p1, %p999_p12 }
  0x84   :  { %855 = vmatprep.subr.bf16.mxu1 %v1035_v3 }
  0x85   :  { %833 = vmatpush3.bf16.msra.mxu0 %v832_v9 }
  0x86   :  { %834 = vmatprep.subr.bf16.mxu0 %v1035_v3 }
  0x87   :  { %857 = vmatpush3.bf16.msra.mxu1 %v856_v34 }
  0x88   :  { %858 = vmatprep.subr.bf16.mxu1 %v1035_v3 }
  0x89   :  { %836 = vmatpush3.bf16.msra.mxu0 %v835_v12 }
  0x8a   :  { %837 = vmatprep.subr.bf16.mxu0 %v1035_v3 }
  0x8b   :  { %860 = vmatpush3.bf16.msra.mxu1 %v859_v37 }
  0x8c   :  { %861 = vmatprep.subr.bf16.mxu1 %v1035_v3 }
  0x8d   :  { %839 = vmatpush3.bf16.msra.mxu0 %v838_v15 }
  0x8e   :  { %840 = vmatprep.subr.bf16.mxu0 %v1035_v3 }
  0x8f   :  { %863 = vmatpush3.bf16.msra.mxu1 %v862_v40 }
  0x90   :  { %864 = vmatprep.subr.bf16.mxu1 %v1035_v3 }
  0x91   :  { %842 = vmatpush3.bf16.msra.mxu0 %v841_v18 }
  0x92   :  { %843 = vmatprep.subr.bf16.mxu0 %v1035_v3 }
  0x93   :  { %866 = vmatpush3.bf16.msra.mxu1 %v865_v43 }
  0x94   :  { %867 = vmatprep.subr.bf16.mxu1 %v1035_v3 }
  0x95   :  { %845 = vmatpush3.bf16.msra.mxu0 %v844_v21 }
  0x96   :  { %846 = vmatprep.subr.bf16.mxu0 %v1035_v3 }
  0x97   :  { %869 = vmatpush3.bf16.msra.mxu1 %v868_v46 }
  0x98   :  { %870 = vmatprep.subr.bf16.mxu1 %v1035_v3 }
  0x99   :  { %848 = vmatpush3.bf16.msra.mxu0 %v847_v24 }
  0x9b   :  { %872 = vmatpush3.bf16.msra.mxu1 %v871_v59 }
 0x14f   :  { %v619_v47 = vpop.f32.mrb[0].mxu0 }
 0x150   :  { %v620_v49 = vpop.f32.mrb[1].mxu0 }
 0x151   :  { %v654_v50 = vpop.f32.mrb[0].mxu1  ;;  %v621_v51 = vadd.f32 %v620_v49, %v619_v47 }
 0x152   :  { %v655_v52 = vpop.f32.mrb[1].mxu1 }
 0x153   :  { %v656_v53 = vadd.f32 %v655_v52, %v654_v50  ;;  %v295_v54 = vadd.f32 %v621_v51, %v584_v48 }
 0x155   :  { %v365_v55 = vadd.f32 %v656_v53, %v295_v54 }
 0x157   :  { %v368_v56 = vmax.f32 %v365_v55, 0.0 }
 0x159   :  { %724 = vmatmul.mubr.f32.vlgmr.msra.gmra.mrb[2].mxu0 %v368_v56 }
 0x22c   :  { %v458_v61 = vpop.f32.mrb[2].mxu0 }
 0x22d   :  { %v459_v62 = vadd.f32 %v585_v60, %v458_v61  ;;  %v725_v63 = vpop.f32.mrb[3].mxu0 }
 0x22f   :  { %v462_v0 = vmax.f32 %v459_v62, 0.0 }
 0x231   :  { %759 = vmatmul.mubr.f32.vlgmr.msra.gmra.mrb[2].mxu1 %v462_v0 }
 0x304   :  { %v552_v2 = vpop.f32.mrb[2].mxu1 }
 0x305   :  { %v553_v3 = vadd.f32 %v586_v1, %v552_v2  ;;  %v760_v4 = vpop.f32.mrb[3].mxu1 }
 0x307   :  { %556 = vmax.xlane.f32.xlu0 %v553_v3 }
 0x394   :  { %v557_v5 = vpop.xlane.xlu0 %556 }
 0x395   :  { %v558_v6 = vsub.f32 %v553_v3, %v557_v5 }
 0x397   :  { %v559_v7 = vmul.f32 1.442695, %v558_v6 }
 0x399   :  { %884 = vpow2.f32 %v559_v7 }
 0x3a3   :  { %v885_v8 = vpop.eup %884 }
 0x3a4   :  { %561 = vadd.xlane.f32.xlu0 %v885_v8 }
 0x431   :  { %v562_v9 = vpop.xlane.xlu0 %561 }
 0x432   :  { %886 = vlog2.f32 %v562_v9 }
 0x43c   :  { %v887_v10 = vpop.eup %886 }
 0x43d   :  { %v564_v11 = vmul.f32 0.6931472, %v887_v10 }
 0x43f   :  { %v565_v12 = vsub.f32 %v558_v6, %v564_v11 }
 0x441   :  { %566 = vst [vmem:[#allocation11] sm:$0xff] %v565_v12 }
 0x442   :  { %1009 = shalt.err (!%p1006_p2)
}
 0x443   :  { %s1010_s1 = scalar_lea.hbm %s1207_s9, 128 }
 0x444   :  { %p1011_p3 = scmp.ne.s32.totalorder %s1207_s9, %s1010_s1  ;;  %p1014_p4 = scmp.lt.u32.totalorder %s1010_s1, %s1207_s9 }
 0x446   :  { %p1016_p5 = pnand %p1014_p4, %p1011_p3 }
 0x448   :  { %1019 = shalt.err (!%p1016_p5)
}
 0x449   :  { %576 = dma.vmem_to_hbm [thread:$0]  %s574_s29, 128, %s1207_s9, [#allocation4]  }
 0x44a   :  { %1026 = dma.done.wait [#allocation4], 128  }
 0x44b   :  { %1027 = vsyncadd [#allocation4], 4294967168 }
 0x44c   :  { %580 = vsyncpa [#allocation3], 1 }
 0x44d   :  { %581 = vsyncpa [#allocation6], 1 }
 0x44e   :  { %582 = vsyncpa [#allocation9], 1 }
 0x44f   :  { %583 = vsyncpa [#allocation4], 1 }

</bundles_post_ra>
